<compile_context>
chip_gen: v6e
topology: v6e:2x2x1
jax: 0.10.0
libtpu: 0.0.40
codegen_flags: <defaults>
</compile_context>

<pallas_src>
import numpy as np
import jax
import jax.numpy as jnp
from jax.experimental import pallas as pl
from jax.experimental.pallas import tpu as pltpu


def _round_up(x, m):
    return ((x + m - 1) // m) * m


def _choose_tiling(B, max_tile_b=512):
    """Tile-aware batch tiling: tiles are multiples of 128, padding stays small."""
    b128 = _round_up(B, 128)
    num_tiles = max(1, -(-b128 // max_tile_b))          # cdiv
    tile_b = _round_up(-(-B // num_tiles), 128)         # per-tile rows, 128-aligned
    b_pad = num_tiles * tile_b
    return tile_b, b_pad, num_tiles


def _batch_dim_semantics():
    """CORE_PARALLEL on multi-TensorCore chips (v7x); plain parallel elsewhere."""
    try:
        kind = jax.devices()[0].device_kind.lower()
        if "v7" in kind:
            return (pltpu.CORE_PARALLEL,)
    except Exception:
        pass
    return ("parallel",)


def critic_kernel(xt_ref, w1_ref, b1_ref, w2_ref, b2_ref, w3_ref, b3_ref, o_ref):
    """One batch tile, fully transposed: weights @ activations, no in-kernel transpose."""
    xt = xt_ref[...]                                                     # (D, TB) bf16

    # layer 1 (MXU, bf16 in / f32 acc): (H1, D) @ (D, TB); bias + ReLU in f32 on VPU
    h1t = jnp.dot(w1_ref[...], xt, preferred_element_type=jnp.float32)   # (H1, TB)
    h1t = jnp.maximum(h1t + b1_ref[...], 0.0)

    # layer 2 (MXU, bf16 in / f32 acc): (H2, H1) @ (H1, TB)
    h2t = jnp.dot(w2_ref[...], h1t.astype(jnp.bfloat16),
                  preferred_element_type=jnp.float32)                    # (H2, TB)
    h2t = jnp.maximum(h2t + b2_ref[...], 0.0)

    # head (32 -> 1): broadcast-multiply + sublane reduce on VPU/XLU; leaves a
    # lane-dense (1, TB) row instead of an N=1 MXU matmul / width-1 masked stores.
    v = jnp.sum(h2t * w3_ref[...], axis=0, keepdims=True) + b3_ref[...]  # (1, TB)
    o_ref[...] = v


def mlp_critic_v(obs, params, *, max_tile_b=512):
    """Run the Pallas kernel; returns value estimates of shape (B,)."""
    w1, b1, w2, b2, w3, b3 = params        # w1:(H1,D) b1:(H1,1) w2:(H2,H1) b2:(H2,1) w3:(H2,1) b3:(1,1)
    B, D = obs.shape
    H1 = w1.shape[0]
    H2 = w2.shape[0]

    tile_b, b_pad, num_tiles = _choose_tiling(B, max_tile_b)

    # Cast to bf16 first (half the pad/transpose/DMA bytes), pad the batch, then
    # transpose once in the wrapper so the kernel sees a (D, TILE_B) lane-dense tile.
    x = obs.astype(jnp.bfloat16)
    if b_pad != B:
        x = jnp.pad(x, ((0, b_pad - B), (0, 0)))         # zero-pad; sliced off below
    xt = x.T                                              # (D, b_pad)

    w1b = w1.astype(jnp.bfloat16)
    w2b = w2.astype(jnp.bfloat16)

    const2 = lambda i: (0, 0)                             # weights stay resident in VMEM

    flops = 2 * b_pad * (D * H1 + H1 * H2 + H2)
    bytes_accessed = (2 * (b_pad * D + H1 * D + H2 * H1)            # bf16 obs + weights
                      + 4 * (b_pad + H1 + 2 * H2 + 1))              # f32 out + biases + head

    out = pl.pallas_call(
        critic_kernel,
        out_shape=jax.ShapeDtypeStruct((1, b_pad), jnp.float32),
        grid=(num_tiles,),
        in_specs=[
            pl.BlockSpec((D, tile_b), lambda i: (0, i)),   # obs tile (pipelined, lane-dense)
            pl.BlockSpec((H1, D), const2),                 # w1  (out, in)   bf16
            pl.BlockSpec((H1, 1), const2),                 # b1  (out, 1)    f32
            pl.BlockSpec((H2, H1), const2),                # w2  (out, in)   bf16
            pl.BlockSpec((H2, 1), const2),                 # b2  (out, 1)    f32
            pl.BlockSpec((H2, 1), const2),                 # w3  (H2, 1)     f32
            pl.BlockSpec((1, 1), const2),                  # b3  (1, 1)      f32
        ],
        out_specs=pl.BlockSpec((1, tile_b), lambda i: (0, i)),
        compiler_params=pltpu.CompilerParams(
            dimension_semantics=_batch_dim_semantics()),
        cost_estimate=pl.CostEstimate(
            flops=flops, transcendentals=0, bytes_accessed=bytes_accessed),
    )(xt, w1b, b1, w2b, b2, w3, b3)

    # torch.squeeze(..., -1) plus removal of batch padding.
    return out[0, :B]


def mlp_critic_v_ref(obs, params):
    """Pure-JAX f32 reference with identical semantics (for correctness check)."""
    w1, b1, w2, b2, w3, b3 = params
    x = obs.astype(jnp.float32)
    h1 = jnp.maximum(x @ w1.T + b1.T, 0.0)
    h2 = jnp.maximum(h1 @ w2.T + b2.T, 0.0)
    v = h2 @ w3 + b3
    return jnp.squeeze(v, -1)


def init_params(key, in_dim, hidden_sizes):
    """Deterministic parameter init (PyTorch Linear-style uniform bounds), (out,in) layout."""
    h1_dim, h2_dim = hidden_sizes

    def lin(k, fan_in, fan_out):
        kw, kb = jax.random.split(k)
        bound = 1.0 / np.sqrt(fan_in)
        w = jax.random.uniform(kw, (fan_out, fan_in), jnp.float32, -bound, bound)
        b = jax.random.uniform(kb, (fan_out,), jnp.float32, -bound, bound)
        return w, b

    k1, k2, k3 = jax.random.split(key, 3)
    w1, b1 = lin(k1, in_dim, h1_dim)        # (H1, D),  bias (H1,)
    w2, b2 = lin(k2, h1_dim, h2_dim)        # (H2, H1), bias (H2,)
    w3, b3 = lin(k3, h2_dim, 1)             # (1, H2),  bias (1,)
    return (w1, b1.reshape(-1, 1),
            w2, b2.reshape(-1, 1),
            w3.reshape(-1, 1),              # head stored (H2, 1)
            b3.reshape(1, 1))


if __name__ == "__main__":
    # Synthetic observation space: {"state": (10,), "goal": (2, 3)} -> obs_dim = 16
    observation_space = {"state": (10,), "goal": (2, 3)}
    obs_dim = int(np.sum([int(np.prod(v)) for _, v in observation_space.items()]))
    act_dim = 4
    hidden_sizes = (32, 32)
    in_dim = obs_dim + act_dim            # 20
    batch = 8

    key = jax.random.PRNGKey(0)
    key, k_obs = jax.random.split(key)
    obs = jax.random.normal(k_obs, (batch, in_dim), jnp.float32)

    params = init_params(key, in_dim, hidden_sizes)

    v = mlp_critic_v(obs, params)
    jax.block_until_ready(v)
    assert v.shape == (batch,), v.shape

    v_ref = mlp_critic_v_ref(obs, params)
    # bf16 MXU inputs (f32 accumulation) => relax tolerance vs. the f32 reference.
    assert jnp.allclose(v, v_ref, atol=2e-2, rtol=2e-2), (v, v_ref)

    print("KERNEL_OK")
</pallas_src>

<mosaic_0001>
module attributes {stable_mosaic.version = 11 : i64} {
  func.func @critic_kernel(%arg0: i32, %arg1: memref<20x128xbf16, #tpu.memory_space<vmem>>, %arg2: memref<32x20xbf16, #tpu.memory_space<vmem>>, %arg3: memref<32x1xf32, #tpu.memory_space<vmem>>, %arg4: memref<32x32xbf16, #tpu.memory_space<vmem>>, %arg5: memref<32x1xf32, #tpu.memory_space<vmem>>, %arg6: memref<32x1xf32, #tpu.memory_space<vmem>>, %arg7: memref<1x1xf32, #tpu.memory_space<vmem>>, %arg8: memref<1x128xf32, #tpu.memory_space<vmem>>) attributes {dimension_semantics = [#tpu.dimension_semantics<parallel>], iteration_bounds = array<i64: 1>, scalar_prefetch = 0 : i64, scratch_operands = 0 : i64, tpu.core_type = #tpu.core_type<tc>, window_params = [{transform_indices = @transform_0, window_bounds = array<i64: 20, 128>}, {pipeline_mode = #tpu.pipeline_mode<synchronous>, transform_indices = @transform_1, window_bounds = array<i64: 32, 20>}, {pipeline_mode = #tpu.pipeline_mode<synchronous>, transform_indices = @transform_2, window_bounds = array<i64: 32, 1>}, {pipeline_mode = #tpu.pipeline_mode<synchronous>, transform_indices = @transform_3, window_bounds = array<i64: 32, 32>}, {pipeline_mode = #tpu.pipeline_mode<synchronous>, transform_indices = @transform_4, window_bounds = array<i64: 32, 1>}, {pipeline_mode = #tpu.pipeline_mode<synchronous>, transform_indices = @transform_5, window_bounds = array<i64: 32, 1>}, {pipeline_mode = #tpu.pipeline_mode<synchronous>, transform_indices = @transform_6, window_bounds = array<i64: 1, 1>}, {transform_indices = @transform_7, window_bounds = array<i64: 1, 128>}]} {
    %c0 = arith.constant 0 : index
    %c0_0 = arith.constant 0 : index
    %0 = vector.load %arg1[%c0, %c0_0] : memref<20x128xbf16, #tpu.memory_space<vmem>>, vector<20x128xbf16>
    %c0_1 = arith.constant 0 : index
    %c0_2 = arith.constant 0 : index
    %1 = vector.load %arg2[%c0_1, %c0_2] : memref<32x20xbf16, #tpu.memory_space<vmem>>, vector<32x20xbf16>
    %cst = arith.constant dense<0.000000e+00> : vector<32x128xf32>
    %2 = tpu.matmul %1, %0, %cst {dimension_numbers = #tpu.dot_dimension_numbers<[1], [0], [0], [1], [0, 0, 1, 1], [], []>} : vector<32x20xbf16>, vector<20x128xbf16>, vector<32x128xf32> -> vector<32x128xf32>
    %c0_3 = arith.constant 0 : index
    %c0_4 = arith.constant 0 : index
    %3 = vector.load %arg3[%c0_3, %c0_4] : memref<32x1xf32, #tpu.memory_space<vmem>>, vector<32x1xf32>
    %4 = vector.broadcast %3 : vector<32x1xf32> to vector<32x128xf32>
    %5 = arith.addf %2, %4 : vector<32x128xf32>
    %cst_5 = arith.constant 0.000000e+00 : f32
    %6 = vector.broadcast %cst_5 : f32 to vector<32x128xf32>
    %7 = arith.maximumf %5, %6 : vector<32x128xf32>
    %c0_6 = arith.constant 0 : index
    %c0_7 = arith.constant 0 : index
    %8 = vector.load %arg4[%c0_6, %c0_7] : memref<32x32xbf16, #tpu.memory_space<vmem>>, vector<32x32xbf16>
    %9 = arith.truncf %7 : vector<32x128xf32> to vector<32x128xbf16>
    %cst_8 = arith.constant dense<0.000000e+00> : vector<32x128xf32>
    %10 = tpu.matmul %8, %9, %cst_8 {dimension_numbers = #tpu.dot_dimension_numbers<[1], [0], [0], [1], [0, 0, 1, 1], [], []>} : vector<32x32xbf16>, vector<32x128xbf16>, vector<32x128xf32> -> vector<32x128xf32>
    %c0_9 = arith.constant 0 : index
    %c0_10 = arith.constant 0 : index
    %11 = vector.load %arg5[%c0_9, %c0_10] : memref<32x1xf32, #tpu.memory_space<vmem>>, vector<32x1xf32>
    %12 = vector.broadcast %11 : vector<32x1xf32> to vector<32x128xf32>
    %13 = arith.addf %10, %12 : vector<32x128xf32>
    %cst_11 = arith.constant 0.000000e+00 : f32
    %14 = vector.broadcast %cst_11 : f32 to vector<32x128xf32>
    %15 = arith.maximumf %13, %14 : vector<32x128xf32>
    %c0_12 = arith.constant 0 : index
    %c0_13 = arith.constant 0 : index
    %16 = vector.load %arg6[%c0_12, %c0_13] : memref<32x1xf32, #tpu.memory_space<vmem>>, vector<32x1xf32>
    %17 = vector.broadcast %16 : vector<32x1xf32> to vector<32x128xf32>
    %18 = arith.mulf %15, %17 : vector<32x128xf32>
    %cst_14 = arith.constant dense<0.000000e+00> : vector<128xf32>
    %19 = vector.multi_reduction <add>, %18, %cst_14 [0] : vector<32x128xf32> to vector<128xf32>
    %20 = vector.shape_cast %19 : vector<128xf32> to vector<1x128xf32>
    %c0_15 = arith.constant 0 : index
    %c0_16 = arith.constant 0 : index
    %21 = vector.load %arg7[%c0_15, %c0_16] : memref<1x1xf32, #tpu.memory_space<vmem>>, vector<1x1xf32>
    %22 = vector.broadcast %21 : vector<1x1xf32> to vector<1x128xf32>
    %23 = arith.addf %20, %22 : vector<1x128xf32>
    %c0_17 = arith.constant 0 : index
    %c0_18 = arith.constant 0 : index
    %24 = vector.load %arg8[%c0_17, %c0_18] : memref<1x128xf32, #tpu.memory_space<vmem>>, vector<1x128xf32>
    tpu.vector_store %arg8[%c0_17, %c0_18], %23 {strides = array<i32>} : memref<1x128xf32, #tpu.memory_space<vmem>>, vector<1x128xf32>,
    return
  }
  func.func @transform_0(%arg0: i32) -> (i32, i32) {
    %c0_i32 = arith.constant 0 : i32
    %c0_i32_0 = arith.constant 0 : i32
    return %c0_i32, %arg0 : i32, i32
  }
  func.func @transform_1(%arg0: i32) -> (i32, i32) {
    %c0_i32 = arith.constant 0 : i32
    %c0_i32_0 = arith.constant 0 : i32
    %c0_i32_1 = arith.constant 0 : i32
    return %c0_i32, %c0_i32_0 : i32, i32
  }
  func.func @transform_2(%arg0: i32) -> (i32, i32) {
    %c0_i32 = arith.constant 0 : i32
    %c0_i32_0 = arith.constant 0 : i32
    %c0_i32_1 = arith.constant 0 : i32
    return %c0_i32, %c0_i32_0 : i32, i32
  }
  func.func @transform_3(%arg0: i32) -> (i32, i32) {
    %c0_i32 = arith.constant 0 : i32
    %c0_i32_0 = arith.constant 0 : i32
    %c0_i32_1 = arith.constant 0 : i32
    return %c0_i32, %c0_i32_0 : i32, i32
  }
  func.func @transform_4(%arg0: i32) -> (i32, i32) {
    %c0_i32 = arith.constant 0 : i32
    %c0_i32_0 = arith.constant 0 : i32
    %c0_i32_1 = arith.constant 0 : i32
    return %c0_i32, %c0_i32_0 : i32, i32
  }
  func.func @transform_5(%arg0: i32) -> (i32, i32) {
    %c0_i32 = arith.constant 0 : i32
    %c0_i32_0 = arith.constant 0 : i32
    %c0_i32_1 = arith.constant 0 : i32
    return %c0_i32, %c0_i32_0 : i32, i32
  }
  func.func @transform_6(%arg0: i32) -> (i32, i32) {
    %c0_i32 = arith.constant 0 : i32
    %c0_i32_0 = arith.constant 0 : i32
    %c0_i32_1 = arith.constant 0 : i32
    return %c0_i32, %c0_i32_0 : i32, i32
  }
  func.func @transform_7(%arg0: i32) -> (i32, i32) {
    %c0_i32 = arith.constant 0 : i32
    %c0_i32_0 = arith.constant 0 : i32
    return %c0_i32, %arg0 : i32, i32
  }
}

</mosaic_0001>

<bundles_post_ra>
// kernel: tpu_custom_call.1
= control target key start
LH: loop header
LB: loop body
LE: loop exit
PB: predicated region body
PF: predicated region fallthrough
CT: control target
= control target key end

     0   :  { %s480_s0 = inlined_call_operand.vmem [shape: bf16[20,128], index: 0, kind: input, shape index: {}]   ;;  %s481_s1 = inlined_call_operand.vmem [shape: bf16[32,20], index: 1, kind: input, shape index: {}]   ;;  %s482_s2 = inlined_call_operand.vmem [shape: f32[32,1], index: 2, kind: input, shape index: {}]   ;;  %s483_s3 = inlined_call_operand.vmem [shape: bf16[32,32], index: 3, kind: input, shape index: {}]   ;;  %s484_s4 = inlined_call_operand.vmem [shape: f32[32,1], index: 4, kind: input, shape index: {}]   ;;  %s485_s5 = inlined_call_operand.vmem [shape: f32[32,1], index: 5, kind: input, shape index: {}]   ;;  %s486_s6 = inlined_call_operand.<no memory space> [shape: f32[1,1], index: 6, kind: input, shape index: {}]   ;;  %s487_s7 = inlined_call_operand.hbm [shape: f32[1,128], index: 7, kind: output, shape index: {}]  }
   0x1   :  { %v12_v0 = vstv %s486_s6 }
   0x2   :  { %13 = vst [vmem:[#allocation2] sm:$0x1] %v12_v0 }
   0x3   :  { %v346_v1 = vld [vmem:[%s480_s0 + $0x8] ss:$0 sps:$4 sm:$0x33]   ;;  %vm87_vm0 = vcmask 1041408   ;;  %v347_v2 = vld [vmem:[%s480_s0] sm:$0xff]   ;;  %vm80_vm1 = vcmask 162816  }
   0x4   :  { %341 = vmatprep.subr.msk.bf16.mxu0 %vm87_vm0, %v346_v1  ;;  %v89_v3 = vsel %vm87_vm0, %v346_v1, 0  ;;  %v348_v4 = vld [vmem:[%s481_s1] sm:$0xff]   ;;  %v39_v5 = vld [vmem:[%s482_s2 + $0x10] sm:$0xff]  ;;  %v374_v6 = vmov 0   ;;  %v349_v8 = vld [vmem:[%s481_s1 + $0x8] sm:$0xff]  }
   0x5   :  { %326 = vmatpush3.bf16.msra.mxu0 %v89_v3  ;;  %329 = vmatprep.mubr.msk.bf16.mxu0 %vm80_vm1, %v348_v4  ;;  %v37_v7 = vld [vmem:[%s482_s2] sm:$0xff]  ;;  %v40_v9 = vld [vmem:[%s482_s2 + $0x18] sm:$0xff]  ;;  %v38_v10 = vld [vmem:[%s482_s2 + $0x8] sm:$0xff] }
   0x6   :  { %327 = vmatprep.subr.bf16.mxu0 %v347_v2  ;;  %344 = vset.pattern.permute.xlu0 %v374_v6 }
   0x7   :  { %345 = vset.pattern.permute.xlu1 %v374_v6  ;;  %53 = vperm.xlu0 %344, %v39_v5  }
   0x8   :  { %43 = vperm.xlu1 %345, %v37_v7  }
   0x9   :  { %328 = vmatpush3.bf16.msra.mxu0 %v347_v2 }
   0xa   :  { %14 = vsyncpa [#allocation4], 0  ;;  %v150_v11 = vld [vmem:[%s484_s4] sm:$0xff]  ;;  %v151_v12 = vld [vmem:[%s484_s4 + $0x8] sm:$0xff]  ;;  %vm184_vm2 = vcmask 261120   ;;  %v287_v2 = vlaneseq }
   0xb   :  { %58 = vperm.xlu0 %344, %v40_v9   ;;  %v152_v13 = vld [vmem:[%s484_s4 + $0x10] sm:$0xff]  ;;  %v153_v14 = vld [vmem:[%s484_s4 + $0x18] sm:$0xff]  ;;  %v244_v15 = vld [vmem:[%s485_s5] sm:$0xff] }
   0xc   :  { %330 = vmatmul.mubr.msk.bf16.vlgmr.msra.gmra.mxu0 %vm80_vm1, %v349_v8  ;;  %48 = vperm.xlu1 %345, %v38_v10   ;;  %v245_v16 = vld [vmem:[%s485_s5 + $0x8] sm:$0xff]  ;;  %v246_v17 = vld [vmem:[%s485_s5 + $0x10] sm:$0xff]  ;;  %v247_v18 = vld [vmem:[%s485_s5 + $0x18] sm:$0xff]  ;;  %v288_v5 = vshrl.u32 %v287_v2, 7 }
   0xd   :  { %v281_v19 = vld [vmem:[#allocation2] sm:$0x1]  ;;  %v351_v39 = vld [vmem:[%s483_s3 + $0x8] sm:$0xff]  }
   0xe   :  { %v350_v20 = vld [vmem:[%s483_s3] sm:$0xff]   ;;  %v289_v8 = vsub.s32 0, %v288_v5  ;;  %s375_s3 = smov [#allocation3]  }
   0xf   :  { %156 = vperm.xlu0 %344, %v150_v11   ;;  %337 = vmatprep.mubr.msk.bf16.mxu1 %vm184_vm2, %v350_v20  ;;  %s299_s9 = sshll.u32 %s375_s3, 4  ;;  %s300_s9 = int_to_ptr.vmem [resolvable:$true] %s299_s9 }
  0x10   :  { %161 = vperm.xlu1 %345, %v151_v12   ;;  %s352_s10 = scalar_lea.vmem %s300_s9, 16  ;;  %s356_s0 = scalar_lea.vmem %s300_s9, 32 }
  0x11   :  { %p353_p0 = scmp.ne.s32.totalorder %s300_s9, %s352_s10  ;;  %p357_p1 = scmp.lt.s32.totalorder %s300_s9, %s300_s9 }
  0x12   :  { %p358_p2 = scmp.lt.s32.totalorder %s356_s0, %s352_s10 }
  0x13   :  { %166 = vperm.xlu0 %344, %v152_v13  }
  0x14   :  { %171 = vperm.xlu1 %345, %v153_v14   ;;  %p359_p3 = por %p358_p2, %p357_p1 }
  0x16   :  { %p360_p4 = pnand %p359_p3, %p353_p0 }
  0x17   :  { %250 = vperm.xlu0 %344, %v244_v15  }
  0x18   :  { %255 = vperm.xlu1 %345, %v245_v16  }
  0x1b   :  { %260 = vperm.xlu0 %344, %v246_v17  }
  0x1c   :  { %265 = vperm.xlu1 %345, %v247_v18  }
  0x1f   :  { %284 = vperm.xlu0 %344, %v281_v19  }
  0x82   :  { %v54_v21 = vpop.permute.xlu0 %53 }
  0x83   :  { %v44_v22 = vpop.permute.xlu1 %43 }
  0x86   :  { %v59_v26 = vpop.permute.xlu0 %58 }
  0x87   :  { %v49_v30 = vpop.permute.xlu1 %48 }
  0x8a   :  { %v157_v40 = vpop.permute.xlu0 %156 }
  0x8b   :  { %v162_v41 = vpop.permute.xlu1 %161 }
  0x8e   :  { %v167_v42 = vpop.permute.xlu0 %166 }
  0x8f   :  { %v172_v44 = vpop.permute.xlu1 %171 }
  0x92   :  { %v251_v49 = vpop.permute.xlu0 %250 }
  0x93   :  { %v256_v54 = vpop.permute.xlu1 %255 }
  0x96   :  { %v261_v60 = vpop.permute.xlu0 %260 }
  0x97   :  { %v266_v63 = vpop.permute.xlu1 %265 }
  0x9a   :  { %v285_v10 = vpop.permute.xlu0 %284 }
  0x9b   :  { %v290_v12 = vrot.slane %v285_v10, %v289_v8 }
  0xcc   :  { %v331_v23 = vpop.f32.mrf.mxu0 }
  0xcd   :  { %v134_v25 = vadd.f32 %v331_v23, %v54_v21 }
  0xce   :  { %v125_v24 = vpop.f32.mrf.mxu0 }
  0xcf   :  { %v126_v28 = vadd.f32 %v125_v24, %v44_v22  ;;  %v142_v32 = vmax.f32 %v134_v25, 0.0 }
  0xd0   :  { %v332_v27 = vpop.f32.mrf.mxu0 }
  0xd1   :  { %v137_v29 = vadd.f32 %v332_v27, %v59_v26  ;;  %v140_v35 = vmax.f32 %v126_v28, 0.0 }
  0xd2   :  { %v128_v31 = vpop.f32.mrf.mxu0 }
  0xd3   :  { %v143_v33 = vmax.f32 %v137_v29, 0.0  ;;  %v129_v34 = vadd.f32 %v128_v31, %v49_v30 }
  0xd5   :  { %v141_v36 = vmax.f32 %v129_v34, 0.0  ;;  %v149_v37 = vpack.c.bf16 %v143_v33, %v142_v32 }
  0xd7   :  { %v148_v38 = vpack.c.bf16 %v141_v36, %v140_v35  ;;  %333 = vmatprep.subr.bf16.mxu1 %v149_v37 }
  0xd8   :  { %334 = vmatpush3.bf16.msra.mxu1 %v149_v37 }
  0xd9   :  { %335 = vmatprep.subr.bf16.mxu1 %v148_v38 }
  0xdc   :  { %336 = vmatpush3.bf16.msra.mxu1 %v148_v38 }
  0xdf   :  { %338 = vmatmul.mubr.msk.bf16.vlgmr.msra.gmra.mxu1 %vm184_vm2, %v351_v39 }
 0x19f   :  { %v339_v43 = vpop.f32.mrf.mxu1 }
 0x1a0   :  { %v234_v48 = vadd.f32 %v339_v43, %v167_v42 }
 0x1a1   :  { %v225_v45 = vpop.f32.mrf.mxu1 }
 0x1a2   :  { %v226_v46 = vadd.f32 %v225_v45, %v157_v40  ;;  %v242_v55 = vmax.f32 %v234_v48, 0.0 }
 0x1a3   :  { %v340_v47 = vpop.f32.mrf.mxu1 }
 0x1a4   :  { %v240_v51 = vmax.f32 %v226_v46, 0.0  ;;  %v237_v52 = vadd.f32 %v340_v47, %v172_v44  ;;  %v270_v61 = vmul.f32 %v261_v60, %v242_v55 }
 0x1a5   :  { %v228_v50 = vpop.f32.mrf.mxu1 }
 0x1a6   :  { %v229_v53 = vadd.f32 %v228_v50, %v162_v41  ;;  %v268_v57 = vmul.f32 %v251_v49, %v240_v51  ;;  %v243_v58 = vmax.f32 %v237_v52, 0.0 }
 0x1a8   :  { %v241_v56 = vmax.f32 %v229_v53, 0.0  ;;  %v271_v0 = vmul.f32 %v266_v63, %v243_v58 }
 0x1aa   :  { %v269_v59 = vmul.f32 %v256_v54, %v241_v56 }
 0x1ac   :  { %v272_v62 = vadd.f32 %v269_v59, %v268_v57 }
 0x1ae   :  { %v273_v1 = vadd.f32 %v272_v62, %v270_v61 }
 0x1b0   :  { %v274_v3 = vadd.f32 %v273_v1, %v271_v0 }
 0x1b2   :  { %v275_v4 = vrot.slane %v274_v3, 4 }
 0x1b4   :  { %v276_v6 = vadd.f32 %v275_v4, %v274_v3 }
 0x1b6   :  { %v277_v7 = vrot.slane %v276_v6, 2 }
 0x1b8   :  { %v278_v9 = vadd.f32 %v277_v7, %v276_v6 }
 0x1ba   :  { %v279_v11 = vrot.slane %v278_v9, 1 }
 0x1bc   :  { %v280_v13 = vadd.f32 %v279_v11, %v278_v9 }
 0x1be   :  { %v291_v14 = vadd.f32 %v290_v12, %v280_v13 }
 0x1c0   :  { %292 = vst [vmem:[#allocation3] sm:$0x1] %v291_v14 }
 0x1c1   :  { %363 = shalt.err (!%p360_p4)
}
 0x1c2   :  { %302 = dma.vmem_to_hbm [thread:$0]  %s300_s9, 16, %s487_s7, [#allocation4]  }
 0x1c3   :  { %372 = dma.done.wait [#allocation4], 16  }
 0x1c4   :  { %373 = vsyncadd [#allocation4], 4294967280 }
 0x1c5   :  { %306 = vsyncpa [#allocation4], 1 }

</bundles_post_ra>
